<compile_context>
chip_gen: v5e
topology: v5e:2x2
jax: 0.10.0
libtpu: 0.0.40
codegen_flags: <defaults>
</compile_context>

<pallas_src>
import numpy as np

import jax
import jax.numpy as jnp
from jax import lax
from jax.experimental import pallas as pl
from jax.experimental.pallas import tpu as pltpu

# Fixed separable Gaussian from EdgeLoss.__init__ (K2 = outer(k1, k1)).
_K1 = (0.05, 0.25, 0.4, 0.25, 0.05)
EPS = 1e-3  # CharbonnierLoss eps


def _edge_loss_kernel(x_ref, y_ref, mwt_ref, mask_ref, out_ref, pad_ref, acc_ref):
    # x_ref/y_ref: (Bt, H, W); mwt_ref: (W, W) horizontal Toeplitz (transposed);
    # mask_ref: (1, H, W) {4.0, 0.0} even-pixel mask; out_ref: (1, 8, 128)
    # partial-sum block (per parallel index p); pad_ref: (Bt, H+4, W) vertical
    # padding scratch; acc_ref: (H, W) Charbonnier accumulator.
    Bt, H, W = x_ref.shape
    b = pl.program_id(1)

    @pl.when(b == 0)
    def _():
        acc_ref[...] = jnp.zeros_like(acc_ref)

    mwt = mwt_ref[...]          # (W, W)
    mask4 = mask_ref[...]       # (1, H, W)

    def conv_gauss(a):
        # Horizontal 5-tap (replicate pad baked into the Toeplitz matrix) on
        # the MXU; result stays lane-dense (Bt, H, W).
        h = jnp.dot(a.reshape(Bt * H, W), mwt,
                    preferred_element_type=jnp.float32).reshape(Bt, H, W)
        # Vertical 5-tap on the VPU via top/bottom replicate-padded scratch.
        pad_ref[:, 2:H + 2, :] = h
        top = h[:, 0:1, :]
        bot = h[:, H - 1:H, :]
        pad_ref[:, 0:1, :] = top
        pad_ref[:, 1:2, :] = top
        pad_ref[:, H + 2:H + 3, :] = bot
        pad_ref[:, H + 3:H + 4, :] = bot
        v = _K1[0] * pad_ref[:, 0:H, :]
        for i in range(1, 5):
            v = v + _K1[i] * pad_ref[:, i:i + H, :]
        return v

    # Linearity: laplacian(x) - laplacian(y) == laplacian(x - y).
    d0 = x_ref[...].astype(jnp.float32) - y_ref[...].astype(jnp.float32)
    f1 = conv_gauss(d0)
    nf = f1 * mask4                       # even pixels * 4, zeros elsewhere
    d = d0 - conv_gauss(nf)
    # Elementwise (VPU/EUP-only) accumulation; no per-step cross-lane reduce.
    acc_ref[...] += jnp.sum(jnp.sqrt(d * d + EPS * EPS), axis=0)

    @pl.when(b == pl.num_programs(1) - 1)
    def _():
        out_ref[...] = jnp.full(out_ref.shape, jnp.sum(acc_ref[...]), out_ref.dtype)


def _toeplitz_replicate_T(L):
    """(L, L) matrix T with (a @ T)[.., o] == 5-tap replicate-padded conv of a."""
    m = np.zeros((L, L), np.float32)
    for o in range(L):
        for t in range(5):
            i = min(max(o + t - 2, 0), L - 1)
            m[o, i] += _K1[t]
    return jnp.asarray(m.T)


def _even_mask(H, W):
    rr = (np.arange(H) % 2) == 0
    cc = (np.arange(W) % 2) == 0
    m = np.where(np.logical_and.outer(rr, cc), 4.0, 0.0).astype(np.float32)
    return jnp.asarray(m[None])           # (1, H, W)


def _vmem_limit_bytes():
    cap = 128 * 1024 * 1024
    try:
        cap = int(pltpu.get_tpu_info().vmem_capacity_bytes)
    except Exception:
        pass
    # ~55% of physical capacity, never above 48 MiB (v5e/v6e sweet spot;
    # ~35 MiB on v7x's 64 MiB VMEM -> leaves headroom for Mosaic scratch).
    return min(int(0.55 * cap), 48 * 1024 * 1024)


def _plan_tiling(B, H, W, budget_bytes):
    """Pick Bt (slices per step) and split the block axis over P cores."""
    per_slice = 48 * H * W  # rough bytes/slice: 2 dbl-buffered inputs + pad + temps
    cap = max(1, budget_bytes // per_slice)
    divs = [d for d in range(1, B + 1) if B % d == 0 and d <= cap]
    # Prefer an even number of grid blocks so both v7x TensorCores get work.
    even = [d for d in divs if (B // d) % 2 == 0]
    bt = max(even) if even else max(divs)
    nblocks = B // bt
    P = 2 if nblocks % 2 == 0 else 1
    return bt, nblocks // P, P


def edge_loss(x, y):
    """EdgeLoss.forward(x, y); x, y: (N, C, H, W) (C=3 to match PyTorch)."""
    N, C, H, W = x.shape
    B = N * C
    xf = x.reshape(B, H, W)   # no wrapper-side dtype cast; upcast in-kernel
    yf = y.reshape(B, H, W)

    vmem_limit = _vmem_limit_bytes()
    Bt, Bn, P = _plan_tiling(B, H, W, int(0.6 * vmem_limit))

    mwt = _toeplitz_replicate_T(W)
    mask4 = _even_mask(H, W)

    in_idx = lambda p, b: (p * Bn + b, 0, 0)

    partial = pl.pallas_call(
        _edge_loss_kernel,
        out_shape=jax.ShapeDtypeStruct((P, 8, 128), jnp.float32),
        grid=(P, Bn),
        in_specs=[
            pl.BlockSpec((Bt, H, W), in_idx),
            pl.BlockSpec((Bt, H, W), in_idx),
            pl.BlockSpec((W, W), lambda p, b: (0, 0)),       # resident constant
            pl.BlockSpec((1, H, W), lambda p, b: (0, 0, 0)),  # resident constant
        ],
        out_specs=pl.BlockSpec((1, 8, 128), lambda p, b: (p, 0, 0)),
        scratch_shapes=[
            pltpu.VMEM((Bt, H + 4, W), jnp.float32),  # vertical-pad scratch
            pltpu.VMEM((H, W), jnp.float32),          # Charbonnier accumulator
        ],
        compiler_params=pltpu.CompilerParams(
            dimension_semantics=("parallel", "arbitrary"),
            vmem_limit_bytes=vmem_limit,
        ),
    )(xf, yf, mwt, mask4)

    total = jnp.sum(partial[:, 0, 0])
    return total / (N * C * H * W)   # Charbonnier mean


# ---------------- pure-JAX reference (verification only) ----------------
def _ref_conv_gauss(img):
    C = img.shape[1]
    k1 = jnp.asarray(_K1, jnp.float32)
    w = jnp.broadcast_to(jnp.outer(k1, k1), (C, 1, 5, 5))
    imgp = jnp.pad(img, ((0, 0), (0, 0), (2, 2), (2, 2)), mode="edge")
    return lax.conv_general_dilated(
        imgp, w, (1, 1), "VALID", feature_group_count=C,
        dimension_numbers=("NCHW", "OIHW", "NCHW"))


def _ref_laplacian(cur):
    f = _ref_conv_gauss(cur)
    nf = jnp.zeros_like(f).at[:, :, ::2, ::2].set(f[:, :, ::2, ::2] * 4.0)
    return cur - _ref_conv_gauss(nf)


def _ref_edge_loss(x, y):
    d = _ref_laplacian(x) - _ref_laplacian(y)
    return jnp.mean(jnp.sqrt(d * d + EPS * EPS))
# -------------------------------------------------------------------------


if __name__ == "__main__":
    key = jax.random.PRNGKey(0)
    kx, ky = jax.random.split(key)
    # EdgeLoss hardcodes 3 channels (kernel.repeat(3, ...)).
    x = jax.random.uniform(kx, (2, 3, 16, 16), dtype=jnp.float32)
    y = jax.random.uniform(ky, (2, 3, 16, 16), dtype=jnp.float32)

    loss = jax.jit(edge_loss)(x, y)
    jax.block_until_ready(loss)

    ref = _ref_edge_loss(x, y)
    assert abs(float(loss) - float(ref)) < 5e-5, (float(loss), float(ref))
    print("KERNEL_OK")
</pallas_src>

<mosaic_0001>
module attributes {stable_mosaic.version = 11 : i64} {
  func.func @_edge_loss_kernel(%arg0: i32, %arg1: i32, %arg2: memref<3x16x16xf32, #tpu.memory_space<vmem>>, %arg3: memref<3x16x16xf32, #tpu.memory_space<vmem>>, %arg4: memref<16x16xf32, #tpu.memory_space<vmem>>, %arg5: memref<1x16x16xf32, #tpu.memory_space<vmem>>, %arg6: memref<1x8x128xf32, #tpu.memory_space<vmem>>, %arg7: memref<3x20x16xf32, #tpu.memory_space<vmem>>, %arg8: memref<16x16xf32, #tpu.memory_space<vmem>>) attributes {dimension_semantics = [#tpu.dimension_semantics<parallel>, #tpu.dimension_semantics<arbitrary>], iteration_bounds = array<i64: 2, 1>, scalar_prefetch = 0 : i64, scratch_operands = 2 : i64, tpu.core_type = #tpu.core_type<tc>, window_params = [{transform_indices = @transform_0, window_bounds = array<i64: 3, 16, 16>}, {transform_indices = @transform_1, window_bounds = array<i64: 3, 16, 16>}, {pipeline_mode = #tpu.pipeline_mode<synchronous>, transform_indices = @transform_2, window_bounds = array<i64: 16, 16>}, {pipeline_mode = #tpu.pipeline_mode<synchronous>, transform_indices = @transform_3, window_bounds = array<i64: 1, 16, 16>}, {transform_indices = @transform_4, window_bounds = array<i64: 1, 8, 128>}]} {
    %c0_i32 = arith.constant 0 : i32
    %0 = arith.cmpi eq, %arg1, %c0_i32 : i32
    %1 = arith.extui %0 : i1 to i32
    %c0_i32_0 = arith.constant 0 : i32
    %2 = arith.cmpi ne, %1, %c0_i32_0 : i32
    scf.if %2 {
      %cst_84 = arith.constant 0.000000e+00 : f32
      %80 = vector.broadcast %cst_84 : f32 to vector<16x16xf32>
      %c0_85 = arith.constant 0 : index
      %c0_86 = arith.constant 0 : index
      %81 = vector.load %arg8[%c0_85, %c0_86] : memref<16x16xf32, #tpu.memory_space<vmem>>, vector<16x16xf32>
      tpu.vector_store %arg8[%c0_85, %c0_86], %80 {strides = array<i32>} : memref<16x16xf32, #tpu.memory_space<vmem>>, vector<16x16xf32>,
    } else {
    }
    %c0 = arith.constant 0 : index
    %c0_1 = arith.constant 0 : index
    %3 = vector.load %arg4[%c0, %c0_1] : memref<16x16xf32, #tpu.memory_space<vmem>>, vector<16x16xf32>
    %c0_2 = arith.constant 0 : index
    %c0_3 = arith.constant 0 : index
    %c0_4 = arith.constant 0 : index
    %4 = vector.load %arg5[%c0_2, %c0_3, %c0_4] : memref<1x16x16xf32, #tpu.memory_space<vmem>>, vector<1x16x16xf32>
    %c0_5 = arith.constant 0 : index
    %c0_6 = arith.constant 0 : index
    %c0_7 = arith.constant 0 : index
    %5 = vector.load %arg2[%c0_5, %c0_6, %c0_7] : memref<3x16x16xf32, #tpu.memory_space<vmem>>, vector<3x16x16xf32>
    %c0_8 = arith.constant 0 : index
    %c0_9 = arith.constant 0 : index
    %c0_10 = arith.constant 0 : index
    %6 = vector.load %arg3[%c0_8, %c0_9, %c0_10] : memref<3x16x16xf32, #tpu.memory_space<vmem>>, vector<3x16x16xf32>
    %7 = arith.subf %5, %6 : vector<3x16x16xf32>
    %8 = vector.shape_cast %7 : vector<3x16x16xf32> to vector<48x16xf32>
    %cst = arith.constant dense<0.000000e+00> : vector<48x16xf32>
    %9 = tpu.matmul %8, %3, %cst {dimension_numbers = #tpu.dot_dimension_numbers<[1], [0], [0], [1], [0, 0, 1, 1], [], []>} : vector<48x16xf32>, vector<16x16xf32>, vector<48x16xf32> -> vector<48x16xf32>
    %10 = vector.shape_cast %9 : vector<48x16xf32> to vector<3x16x16xf32>
    %c0_11 = arith.constant 0 : index
    %c2 = arith.constant 2 : index
    %c0_12 = arith.constant 0 : index
    %11 = vector.load %arg7[%c0_11, %c2, %c0_12] : memref<3x20x16xf32, #tpu.memory_space<vmem>>, vector<3x16x16xf32>
    tpu.vector_store %arg7[%c0_11, %c2, %c0_12], %10 {strides = array<i32>} : memref<3x20x16xf32, #tpu.memory_space<vmem>>, vector<3x16x16xf32>,
    %12 = vector.extract_strided_slice %10 {offsets = [0, 0, 0], sizes = [3, 1, 16], strides = [1, 1, 1]} : vector<3x16x16xf32> to vector<3x1x16xf32>
    %13 = vector.extract_strided_slice %10 {offsets = [0, 15, 0], sizes = [3, 1, 16], strides = [1, 1, 1]} : vector<3x16x16xf32> to vector<3x1x16xf32>
    %c0_13 = arith.constant 0 : index
    %c0_14 = arith.constant 0 : index
    %c0_15 = arith.constant 0 : index
    %14 = vector.load %arg7[%c0_13, %c0_14, %c0_15] : memref<3x20x16xf32, #tpu.memory_space<vmem>>, vector<3x1x16xf32>
    tpu.vector_store %arg7[%c0_13, %c0_14, %c0_15], %12 {strides = array<i32>} : memref<3x20x16xf32, #tpu.memory_space<vmem>>, vector<3x1x16xf32>,
    %c0_16 = arith.constant 0 : index
    %c1 = arith.constant 1 : index
    %c0_17 = arith.constant 0 : index
    %15 = vector.load %arg7[%c0_16, %c1, %c0_17] : memref<3x20x16xf32, #tpu.memory_space<vmem>>, vector<3x1x16xf32>
    tpu.vector_store %arg7[%c0_16, %c1, %c0_17], %12 {strides = array<i32>} : memref<3x20x16xf32, #tpu.memory_space<vmem>>, vector<3x1x16xf32>,
    %c0_18 = arith.constant 0 : index
    %c18 = arith.constant 18 : index
    %c0_19 = arith.constant 0 : index
    %16 = vector.load %arg7[%c0_18, %c18, %c0_19] : memref<3x20x16xf32, #tpu.memory_space<vmem>>, vector<3x1x16xf32>
    tpu.vector_store %arg7[%c0_18, %c18, %c0_19], %13 {strides = array<i32>} : memref<3x20x16xf32, #tpu.memory_space<vmem>>, vector<3x1x16xf32>,
    %c0_20 = arith.constant 0 : index
    %c19 = arith.constant 19 : index
    %c0_21 = arith.constant 0 : index
    %17 = vector.load %arg7[%c0_20, %c19, %c0_21] : memref<3x20x16xf32, #tpu.memory_space<vmem>>, vector<3x1x16xf32>
    tpu.vector_store %arg7[%c0_20, %c19, %c0_21], %13 {strides = array<i32>} : memref<3x20x16xf32, #tpu.memory_space<vmem>>, vector<3x1x16xf32>,
    %c0_22 = arith.constant 0 : index
    %c0_23 = arith.constant 0 : index
    %c0_24 = arith.constant 0 : index
    %18 = vector.load %arg7[%c0_22, %c0_23, %c0_24] : memref<3x20x16xf32, #tpu.memory_space<vmem>>, vector<3x16x16xf32>
    %cst_25 = arith.constant 5.000000e-02 : f32
    %19 = vector.broadcast %cst_25 : f32 to vector<3x16x16xf32>
    %20 = arith.mulf %19, %18 : vector<3x16x16xf32>
    %c0_26 = arith.constant 0 : index
    %c1_27 = arith.constant 1 : index
    %c0_28 = arith.constant 0 : index
    %21 = vector.load %arg7[%c0_26, %c1_27, %c0_28] : memref<3x20x16xf32, #tpu.memory_space<vmem>>, vector<3x16x16xf32>
    %cst_29 = arith.constant 2.500000e-01 : f32
    %22 = vector.broadcast %cst_29 : f32 to vector<3x16x16xf32>
    %23 = arith.mulf %22, %21 : vector<3x16x16xf32>
    %24 = arith.addf %20, %23 : vector<3x16x16xf32>
    %c0_30 = arith.constant 0 : index
    %c2_31 = arith.constant 2 : index
    %c0_32 = arith.constant 0 : index
    %25 = vector.load %arg7[%c0_30, %c2_31, %c0_32] : memref<3x20x16xf32, #tpu.memory_space<vmem>>, vector<3x16x16xf32>
    %cst_33 = arith.constant 4.000000e-01 : f32
    %26 = vector.broadcast %cst_33 : f32 to vector<3x16x16xf32>
    %27 = arith.mulf %26, %25 : vector<3x16x16xf32>
    %28 = arith.addf %24, %27 : vector<3x16x16xf32>
    %c0_34 = arith.constant 0 : index
    %c3 = arith.constant 3 : index
    %c0_35 = arith.constant 0 : index
    %29 = vector.load %arg7[%c0_34, %c3, %c0_35] : memref<3x20x16xf32, #tpu.memory_space<vmem>>, vector<3x16x16xf32>
    %cst_36 = arith.constant 2.500000e-01 : f32
    %30 = vector.broadcast %cst_36 : f32 to vector<3x16x16xf32>
    %31 = arith.mulf %30, %29 : vector<3x16x16xf32>
    %32 = arith.addf %28, %31 : vector<3x16x16xf32>
    %c0_37 = arith.constant 0 : index
    %c4 = arith.constant 4 : index
    %c0_38 = arith.constant 0 : index
    %33 = vector.load %arg7[%c0_37, %c4, %c0_38] : memref<3x20x16xf32, #tpu.memory_space<vmem>>, vector<3x16x16xf32>
    %cst_39 = arith.constant 5.000000e-02 : f32
    %34 = vector.broadcast %cst_39 : f32 to vector<3x16x16xf32>
    %35 = arith.mulf %34, %33 : vector<3x16x16xf32>
    %36 = arith.addf %32, %35 : vector<3x16x16xf32>
    %37 = vector.broadcast %4 : vector<1x16x16xf32> to vector<3x16x16xf32>
    %38 = arith.mulf %36, %37 : vector<3x16x16xf32>
    %39 = vector.shape_cast %38 : vector<3x16x16xf32> to vector<48x16xf32>
    %cst_40 = arith.constant dense<0.000000e+00> : vector<48x16xf32>
    %40 = tpu.matmul %39, %3, %cst_40 {dimension_numbers = #tpu.dot_dimension_numbers<[1], [0], [0], [1], [0, 0, 1, 1], [], []>} : vector<48x16xf32>, vector<16x16xf32>, vector<48x16xf32> -> vector<48x16xf32>
    %41 = vector.shape_cast %40 : vector<48x16xf32> to vector<3x16x16xf32>
    %c0_41 = arith.constant 0 : index
    %c2_42 = arith.constant 2 : index
    %c0_43 = arith.constant 0 : index
    %42 = vector.load %arg7[%c0_41, %c2_42, %c0_43] : memref<3x20x16xf32, #tpu.memory_space<vmem>>, vector<3x16x16xf32>
    tpu.vector_store %arg7[%c0_41, %c2_42, %c0_43], %41 {strides = array<i32>} : memref<3x20x16xf32, #tpu.memory_space<vmem>>, vector<3x16x16xf32>,
    %43 = vector.extract_strided_slice %41 {offsets = [0, 0, 0], sizes = [3, 1, 16], strides = [1, 1, 1]} : vector<3x16x16xf32> to vector<3x1x16xf32>
    %44 = vector.extract_strided_slice %41 {offsets = [0, 15, 0], sizes = [3, 1, 16], strides = [1, 1, 1]} : vector<3x16x16xf32> to vector<3x1x16xf32>
    %c0_44 = arith.constant 0 : index
    %c0_45 = arith.constant 0 : index
    %c0_46 = arith.constant 0 : index
    %45 = vector.load %arg7[%c0_44, %c0_45, %c0_46] : memref<3x20x16xf32, #tpu.memory_space<vmem>>, vector<3x1x16xf32>
    tpu.vector_store %arg7[%c0_44, %c0_45, %c0_46], %43 {strides = array<i32>} : memref<3x20x16xf32, #tpu.memory_space<vmem>>, vector<3x1x16xf32>,
    %c0_47 = arith.constant 0 : index
    %c1_48 = arith.constant 1 : index
    %c0_49 = arith.constant 0 : index
    %46 = vector.load %arg7[%c0_47, %c1_48, %c0_49] : memref<3x20x16xf32, #tpu.memory_space<vmem>>, vector<3x1x16xf32>
    tpu.vector_store %arg7[%c0_47, %c1_48, %c0_49], %43 {strides = array<i32>} : memref<3x20x16xf32, #tpu.memory_space<vmem>>, vector<3x1x16xf32>,
    %c0_50 = arith.constant 0 : index
    %c18_51 = arith.constant 18 : index
    %c0_52 = arith.constant 0 : index
    %47 = vector.load %arg7[%c0_50, %c18_51, %c0_52] : memref<3x20x16xf32, #tpu.memory_space<vmem>>, vector<3x1x16xf32>
    tpu.vector_store %arg7[%c0_50, %c18_51, %c0_52], %44 {strides = array<i32>} : memref<3x20x16xf32, #tpu.memory_space<vmem>>, vector<3x1x16xf32>,
    %c0_53 = arith.constant 0 : index
    %c19_54 = arith.constant 19 : index
    %c0_55 = arith.constant 0 : index
    %48 = vector.load %arg7[%c0_53, %c19_54, %c0_55] : memref<3x20x16xf32, #tpu.memory_space<vmem>>, vector<3x1x16xf32>
    tpu.vector_store %arg7[%c0_53, %c19_54, %c0_55], %44 {strides = array<i32>} : memref<3x20x16xf32, #tpu.memory_space<vmem>>, vector<3x1x16xf32>,
    %c0_56 = arith.constant 0 : index
    %c0_57 = arith.constant 0 : index
    %c0_58 = arith.constant 0 : index
    %49 = vector.load %arg7[%c0_56, %c0_57, %c0_58] : memref<3x20x16xf32, #tpu.memory_space<vmem>>, vector<3x16x16xf32>
    %cst_59 = arith.constant 5.000000e-02 : f32
    %50 = vector.broadcast %cst_59 : f32 to vector<3x16x16xf32>
    %51 = arith.mulf %50, %49 : vector<3x16x16xf32>
    %c0_60 = arith.constant 0 : index
    %c1_61 = arith.constant 1 : index
    %c0_62 = arith.constant 0 : index
    %52 = vector.load %arg7[%c0_60, %c1_61, %c0_62] : memref<3x20x16xf32, #tpu.memory_space<vmem>>, vector<3x16x16xf32>
    %cst_63 = arith.constant 2.500000e-01 : f32
    %53 = vector.broadcast %cst_63 : f32 to vector<3x16x16xf32>
    %54 = arith.mulf %53, %52 : vector<3x16x16xf32>
    %55 = arith.addf %51, %54 : vector<3x16x16xf32>
    %c0_64 = arith.constant 0 : index
    %c2_65 = arith.constant 2 : index
    %c0_66 = arith.constant 0 : index
    %56 = vector.load %arg7[%c0_64, %c2_65, %c0_66] : memref<3x20x16xf32, #tpu.memory_space<vmem>>, vector<3x16x16xf32>
    %cst_67 = arith.constant 4.000000e-01 : f32
    %57 = vector.broadcast %cst_67 : f32 to vector<3x16x16xf32>
    %58 = arith.mulf %57, %56 : vector<3x16x16xf32>
    %59 = arith.addf %55, %58 : vector<3x16x16xf32>
    %c0_68 = arith.constant 0 : index
    %c3_69 = arith.constant 3 : index
    %c0_70 = arith.constant 0 : index
    %60 = vector.load %arg7[%c0_68, %c3_69, %c0_70] : memref<3x20x16xf32, #tpu.memory_space<vmem>>, vector<3x16x16xf32>
    %cst_71 = arith.constant 2.500000e-01 : f32
    %61 = vector.broadcast %cst_71 : f32 to vector<3x16x16xf32>
    %62 = arith.mulf %61, %60 : vector<3x16x16xf32>
    %63 = arith.addf %59, %62 : vector<3x16x16xf32>
    %c0_72 = arith.constant 0 : index
    %c4_73 = arith.constant 4 : index
    %c0_74 = arith.constant 0 : index
    %64 = vector.load %arg7[%c0_72, %c4_73, %c0_74] : memref<3x20x16xf32, #tpu.memory_space<vmem>>, vector<3x16x16xf32>
    %cst_75 = arith.constant 5.000000e-02 : f32
    %65 = vector.broadcast %cst_75 : f32 to vector<3x16x16xf32>
    %66 = arith.mulf %65, %64 : vector<3x16x16xf32>
    %67 = arith.addf %63, %66 : vector<3x16x16xf32>
    %68 = arith.subf %7, %67 : vector<3x16x16xf32>
    %c0_76 = arith.constant 0 : index
    %c0_77 = arith.constant 0 : index
    %69 = vector.load %arg8[%c0_76, %c0_77] : memref<16x16xf32, #tpu.memory_space<vmem>>, vector<16x16xf32>
    %70 = arith.mulf %68, %68 : vector<3x16x16xf32>
    %cst_78 = arith.constant 9.99999997E-7 : f32
    %71 = vector.broadcast %cst_78 : f32 to vector<3x16x16xf32>
    %72 = arith.addf %70, %71 : vector<3x16x16xf32>
    %73 = math.sqrt %72 : vector<3x16x16xf32>
    %cst_79 = arith.constant dense<0.000000e+00> : vector<16x16xf32>
    %74 = vector.multi_reduction <add>, %73, %cst_79 [0] : vector<3x16x16xf32> to vector<16x16xf32>
    %75 = arith.addf %69, %74 : vector<16x16xf32>
    %c0_80 = arith.constant 0 : index
    %c0_81 = arith.constant 0 : index
    %76 = vector.load %arg8[%c0_80, %c0_81] : memref<16x16xf32, #tpu.memory_space<vmem>>, vector<16x16xf32>
    tpu.vector_store %arg8[%c0_80, %c0_81], %75 {strides = array<i32>} : memref<16x16xf32, #tpu.memory_space<vmem>>, vector<16x16xf32>,
    %c0_i32_82 = arith.constant 0 : i32
    %77 = arith.cmpi eq, %arg1, %c0_i32_82 : i32
    %78 = arith.extui %77 : i1 to i32
    %c0_i32_83 = arith.constant 0 : i32
    %79 = arith.cmpi ne, %78, %c0_i32_83 : i32
    scf.if %79 {
      %c0_84 = arith.constant 0 : index
      %c0_85 = arith.constant 0 : index
      %80 = vector.load %arg8[%c0_84, %c0_85] : memref<16x16xf32, #tpu.memory_space<vmem>>, vector<16x16xf32>
      %81 = vector.shape_cast %80 : vector<16x16xf32> to vector<1x16x16xf32>
      %cst_86 = arith.constant dense<0.000000e+00> : vector<1xf32>
      %82 = vector.multi_reduction <add>, %81, %cst_86 [1, 2] : vector<1x16x16xf32> to vector<1xf32>
      %83 = vector.shape_cast %82 : vector<1xf32> to vector<1x1x1xf32>
      %84 = vector.extract %83[0, 0, 0] : f32 from vector<1x1x1xf32>
      %85 = vector.broadcast %84 : f32 to vector<1x8x128xf32>
      %c0_87 = arith.constant 0 : index
      %c0_88 = arith.constant 0 : index
      %c0_89 = arith.constant 0 : index
      %86 = vector.load %arg6[%c0_87, %c0_88, %c0_89] : memref<1x8x128xf32, #tpu.memory_space<vmem>>, vector<1x8x128xf32>
      tpu.vector_store %arg6[%c0_87, %c0_88, %c0_89], %85 {strides = array<i32>} : memref<1x8x128xf32, #tpu.memory_space<vmem>>, vector<1x8x128xf32>,
    } else {
    }
    return
  }
  func.func @transform_0(%arg0: i32, %arg1: i32) -> (i32, i32, i32) {
    %c1_i32 = arith.constant 1 : i32
    %0 = arith.muli %arg0, %c1_i32 : i32
    %1 = arith.addi %0, %arg1 : i32
    %c0_i32 = arith.constant 0 : i32
    %c0_i32_0 = arith.constant 0 : i32
    %c0_i32_1 = arith.constant 0 : i32
    return %1, %c0_i32, %c0_i32_0 : i32, i32, i32
  }
  func.func @transform_1(%arg0: i32, %arg1: i32) -> (i32, i32, i32) {
    %c1_i32 = arith.constant 1 : i32
    %0 = arith.muli %arg0, %c1_i32 : i32
    %1 = arith.addi %0, %arg1 : i32
    %c0_i32 = arith.constant 0 : i32
    %c0_i32_0 = arith.constant 0 : i32
    %c0_i32_1 = arith.constant 0 : i32
    return %1, %c0_i32, %c0_i32_0 : i32, i32, i32
  }
  func.func @transform_2(%arg0: i32, %arg1: i32) -> (i32, i32) {
    %c0_i32 = arith.constant 0 : i32
    %c0_i32_0 = arith.constant 0 : i32
    %c0_i32_1 = arith.constant 0 : i32
    return %c0_i32, %c0_i32_0 : i32, i32
  }
  func.func @transform_3(%arg0: i32, %arg1: i32) -> (i32, i32, i32) {
    %c0_i32 = arith.constant 0 : i32
    %c0_i32_0 = arith.constant 0 : i32
    %c0_i32_1 = arith.constant 0 : i32
    %c0_i32_2 = arith.constant 0 : i32
    return %c0_i32, %c0_i32_0, %c0_i32_1 : i32, i32, i32
  }
  func.func @transform_4(%arg0: i32, %arg1: i32) -> (i32, i32, i32) {
    %c0_i32 = arith.constant 0 : i32
    %c0_i32_0 = arith.constant 0 : i32
    %c0_i32_1 = arith.constant 0 : i32
    return %arg0, %c0_i32, %c0_i32_0 : i32, i32, i32
  }
}

</mosaic_0001>

<bundles_post_ra>
// kernel: edge_loss.1
= control target key start
LH: loop header
LB: loop body
LE: loop exit
PB: predicated region body
PF: predicated region fallthrough
CT: control target
= control target key end

     0   :  { %s1554_s0 = inlined_call_operand.hbm [shape: f32[6,16,16], index: 0, kind: input, shape index: {}]   ;;  %s1555_s1 = inlined_call_operand.hbm [shape: f32[6,16,16], index: 1, kind: input, shape index: {}]   ;;  %s1556_s2 = inlined_call_operand.hbm [shape: f32[16,16], index: 2, kind: input, shape index: {}]   ;;  %s1557_s3 = inlined_call_operand.hbm [shape: f32[1,16,16], index: 3, kind: input, shape index: {}]   ;;  %s1558_s4 = inlined_call_operand.vmem [shape: f32[2,8,128], index: 4, kind: output, shape index: {}]  }
   0x1   :  { %1560 = sst [smem:[#allocation15_spill]] %s1556_s2 }
   0x2   :  { %1561 = sst [smem:[#allocation16_spill]] %s1557_s3 }
   0x3   :  { %9 = vsyncpa [#allocation5], 0 }
   0x4   :  { %11 = vsyncpa [#allocation5 + $0x1], 0 }
   0x5   :  { %12 = vsyncpa [#allocation7], 0 }
   0x6   :  { %14 = vsyncpa [#allocation7 + $0x1], 0 }
   0x7   :  { %15 = vsyncpa [#allocation10], 0  ;;  %s1260_s15 = smov 0   ;;  %s1262_s16 = smov 0  }
   0x8   :  { %s1264_s17 = smov 0   ;;  %s1266_s18 = smov 0  }
   0x9   :  { %s1268_s19 = smov 0   ;;  %s1270_s20 = smov 0  }
   0xa LB: > { %s1559_s21 = sadd.s32 4294967295, %s1228_s20   ;;  %p55_p0 = scmp.ne.s32.totalorder %s1212_s16, %s1208_s15  ;;  %s1228_s20 = sphi %s1270_s20, %s21_s20   ;;  %s1224_s19 = sphi %s1268_s19, %s1573_s19   ;;  %s1220_s18 = sphi %s1266_s18, %s1572_s18   ;;  %s1216_s17 = sphi %s1264_s17, %s1571_s17   ;;  %s1212_s16 = sphi %s1262_s16, %s1570_s16   ;;  %s1208_s15 = sphi %s1260_s15, %s1569_s15  }
   0xb   : > { %p1292_p1 = scmp.eq.s32.totalorder %s1559_s21, 0  ;;  %p909_p2 = scmp.ge.s32.totalorder %s1228_s20, 1 }
   0xc   : > { %p162_p3 = scmp.lt.s32.totalorder %s1228_s20, 3  ;;  %s1564_s2 = sld [smem:[#allocation15_spill]] }
   0xd   : > { %p1300_p4 = por %p1292_p1, %p55_p0  ;;  %s1230_s28 = smov [#allocation8]  }
   0xe   : > { %p1307_p5 = pnand %p909_p2, %p162_p3  ;;  %s175_s29 = sshll.u32 %s1230_s28, 4  ;;  %s176_s29 = int_to_ptr.vmem [resolvable:$true] %s175_s29 }
   0xf   : > { %s1566_s3 = sld [smem:[#allocation16_spill]]  ;;  %s1231_s7 = smov 128  }
  0x10   : > { %p962_p6 = pneg %p1307_p5  ;;  %s1232_s8 = smov 8  }
  0x11   : > { %s1233_s9 = smov [#allocation9]   ;;  %s33_s11 = sadd.s32 1, %s1224_s19 }
  0x12   : > { %s173_s26 = sshll.u32 %s1564_s2, 4  ;;  %p963_p7 = pnand %p962_p6, %p1292_p1  ;;  %s174_s26 = int_to_ptr.hbm [resolvable:$true] %s173_s26 }
  0x13   : > { %s189_s10 = sshll.u32 %s1233_s9, 4  ;;  %s42_s12 = sadd.s32 1, %s1216_s17  ;;  %s190_s10 = int_to_ptr.vmem [resolvable:$true] %s189_s10 }
  0x14   : > { %965 = dma.hbm_to_vmem [thread:$0]  (!%p963_p7), %s174_s26, 256, %s176_s29, [#allocation7], %s1231_s7, %s1231_s7, %s1232_s8  }
  0x15   : > { %s187_s6 = sshll.u32 %s1566_s3, 4  ;;  %p35_p8 = scmp.ge.s32.totalorder %s33_s11, 2  ;;  %s188_s6 = int_to_ptr.hbm [resolvable:$true] %s187_s6 }
  0x16   : > { %968 = dma.hbm_to_vmem [thread:$0]  (!%p963_p7), %s188_s6, 256, %s190_s10, [#allocation10], %s1231_s7, %s1231_s7, %s1232_s8  }
  0x17   : > { %p49_p9 = scmp.ne.s32.totalorder %s1216_s17, %s1212_s16  ;;  %p50_p10 = scmp.eq.s32.totalorder %s1228_s20, 0 }
  0x18   : > { %p978_p11 = scmp.lt.s32.totalorder %s1228_s20, 2  ;;  %s1575_s11 = smov (%p35_p8, %s33_s11), 0 }
  0x19   : > { %p51_p12 = por %p50_p10, %p49_p9  ;;  %s203_s13 = sand.u32 1, %s1216_s17  }
  0x1a   : > { %s39_s14 = ssub.s32 %s1224_s19, %s1575_s11  ;;  %s945_s15 = smul.u32 48, %s203_s13 }
  0x1b   : > { %p40_p13 = scmp.eq.s32.totalorder %s39_s14, 0  ;;  %s939_s24 = smul.u32 48, %s1224_s19 }
  0x1c   : > { %p1336_p0 = pnand %p978_p11, %p51_p12  ;;  %s207_s6 = scalar_lea.vmem [#allocation4], %s945_s15 }
  0x1d   : > { %s1341_s26 = scalar_select %p40_p13, %s1216_s17, %s42_s12  }
  0x1e   : > { %s214_s30 = scalar_lea.hbm %s1554_s0, %s939_s24  ;;  %s217_s9 = sshll.u32 %s207_s6, 4  ;;  %s218_s9 = int_to_ptr.vmem [resolvable:$true] %s217_s9 }
  0x1f   : > { %s215_s5 = sshll.u32 %s214_s30, 4  ;;  %s227_s10 = sand.u32 1, %s1228_s20   ;;  %s216_s5 = int_to_ptr.hbm [resolvable:$true] %s215_s5 }
  0x20   : > { %s204_s14 = scalar_lea.sflag [#allocation5], %s203_s13  ;;  %s238_s2 = scalar_lea.hbm %s1555_s1, %s939_s24 }
  0x21   : > { %972 = dma.hbm_to_vmem [thread:$0]  (!%p1336_p0), %s216_s5, 768, %s218_s9, %s204_s14, %s1231_s7, %s1231_s7, %s1232_s8  }
  0x22   : > { %s231_s3 = scalar_lea.vmem [#allocation6], %s945_s15  ;;  %s239_s29 = sshll.u32 %s238_s2, 4  ;;  %s240_s29 = int_to_ptr.hbm [resolvable:$true] %s239_s29 }
  0x23   : > { %s241_s28 = sshll.u32 %s231_s3, 4  ;;  %s228_s30 = scalar_lea.sflag [#allocation7], %s227_s10  ;;  %s242_s28 = int_to_ptr.vmem [resolvable:$true] %s241_s28 }
  0x24   : > { %975 = dma.hbm_to_vmem [thread:$0]  (!%p1336_p0), %s240_s29, 768, %s242_s28, %s228_s30, %s1231_s7, %s1231_s7, %s1232_s8  }
  0x25   : > { %253 = sbr.rel (%p1307_p5) target bundleno = 610 (0x262), region = 36  ;;  %s255_s13 = sand.u32 (!%p1307_p5), 1, %s1212_s16  }
  0x26   : > { %s947_s5 = smul.u32 (!%p1307_p5), 48, %s255_s13  ;;  %s256_s21 = scalar_lea.sflag (!%p1307_p5), [#allocation5], %s255_s13 }
  0x28   : > { %s1363_s24 = scalar_lea.vmem (!%p1307_p5), [#allocation4], %s947_s5 }
  0x2a   : > { %1191 = dma.done.wait (%p1300_p4), %s256_s21, 768  }
  0x2b   : > { %1193 = vsyncadd (%p1300_p4), %s256_s21, 4294966528  ;;  %s1568_s2 = sadd.s32 4294967295, %s1228_s20   ;;  %s1371_s8 = scalar_lea.vmem [#allocation6], %s947_s5 }
  0x2c   : > { %s265_s3 = sand.u32 1, %s1568_s2  }
  0x2d   : > { %s266_s7 = scalar_lea.sflag [#allocation7], %s265_s3 }
  0x2e   : > { %1195 = dma.done.wait (%p1300_p4), %s266_s7, 768  }
  0x2f   : > { %1197 = vsyncadd (%p1300_p4), %s266_s7, 4294966528 }
  0x30   : > { %1199 = dma.done.wait (%p1292_p1), [#allocation7], 256  }
  0x31   : > { %1201 = vsyncadd (%p1292_p1), [#allocation7], 4294967040 }
  0x32   : > { %1203 = dma.done.wait (%p1292_p1), [#allocation10], 256  }
  0x33   : > { %1205 = vsyncadd (%p1292_p1), [#allocation10], 4294967040  ;;  %v325_v0 = vld [vmem:[#allocation8 + $0x8] sm:$0xff]  ;;  %v324_v1 = vld [vmem:[#allocation8] sm:$0xff]  ;;  %vm321_vm0 = vcmask 130048   ;;  %vm406_vm1 = vcmask 122880  }
  0x34   : > { %v328_v2 = vld [vmem:[%s1363_s24] sm:$0xff]  ;;  %379 = vmatpush.msra.mxu0 %v325_v0  ;;  %941 = vmatpush.msra.mxu2 %v325_v0  ;;  %v331_v4 = vld [vmem:[%s1363_s24 + $0x18] sm:$0xff]  ;;  %v329_v8 = vld [vmem:[%s1363_s24 + $0x8] sm:$0xff]  ;;  %vm413_vm2 = vcmask 130055   ;;  %p313_p1 = scmp.lt.s32.totalorder %s1220_s18, 1 }
  0x35   : > { %v334_v3 = vld [vmem:[%s1371_s8] sm:$0xff]  ;;  %v337_v5 = vld [vmem:[%s1371_s8 + $0x18] sm:$0xff]  ;;  %542 = vmatpush.msra.mxu1 %v325_v0  ;;  %943 = vmatpush.msra.mxu3 %v325_v0  ;;  %v335_v9 = vld [vmem:[%s1371_s8 + $0x8] sm:$0xff] }
  0x36   : > { %v1389_v6 = vsub.f32 %v328_v2, %v334_v3  ;;  %v1391_v7 = vsub.f32 %v331_v4, %v337_v5  ;;  %380 = vmatpush.msra.mxu0 %v324_v1  ;;  %942 = vmatpush.msra.mxu2 %v324_v1  ;;  %v332_v10 = vld [vmem:[%s1363_s24 + $0x20] sm:$0xff]  ;;  %v1401_v12 = vsub.f32 %v329_v8, %v335_v9  ;;  %v330_v14 = vld [vmem:[%s1363_s24 + $0x10] sm:$0xff]  ;;  %v333_v16 = vld [vmem:[%s1363_s24 + $0x28] sm:$0xff]  ;;  %s1577_s18 = smov (!%p313_p1, %s1220_s18), 1 }
  0x37   : > { %v338_v11 = vld [vmem:[%s1371_s8 + $0x20] sm:$0xff]  ;;  %543 = vmatpush.msra.mxu1 %v324_v1  ;;  %944 = vmatpush.msra.mxu3 %v324_v1  ;;  %v336_v15 = vld [vmem:[%s1371_s8 + $0x10] sm:$0xff]  ;;  %v339_v17 = vld [vmem:[%s1371_s8 + $0x28] sm:$0xff]  ;;  %s920_s22 = sshll.u32 %s1577_s18, 3 }
  0x38   : > { %921 = vmatmul.msk.f32.vlgmr.msra.gmra.mxu0 %vm321_vm0, %v1389_v6  ;;  %924 = vmatmul.msk.f32.vlgmr.msra.gmra.mxu2 %vm321_vm0, %v1391_v7  ;;  %v1403_v13 = vsub.f32 %v332_v10, %v338_v11  ;;  %v1413_v18 = vsub.f32 %v330_v14, %v336_v15  ;;  %v1415_v19 = vsub.f32 %v333_v16, %v339_v17  ;;  %v1436_v45 = vld [vmem:[#allocation9] sm:$0xff]  ;;  %v327_v10 = vld [vmem:[#allocation9 + $0x8] sm:$0xff]  ;;  %s316_s15 = scalar_lea.vmem %s1558_s4, %s920_s22 }
  0x40   : > { %922 = vmatmul.msk.f32.gmra.mxu0 %vm321_vm0, %v1401_v12  ;;  %925 = vmatmul.msk.f32.gmra.mxu2 %vm321_vm0, %v1403_v13 }
  0x48   : > { %923 = vmatmul.msk.f32.gmra.mxu0 %vm321_vm0, %v1413_v18  ;;  %926 = vmatmul.msk.f32.gmra.mxu2 %vm321_vm0, %v1415_v19 }
  0xb5   : > { %v382_v20 = vpop.f32.mrf.mxu0 }
  0xb6   : > { %400 = vst.msk [vmem:[#allocation2 + $0x2] sm:$0xff] %vm321_vm0, %v382_v20 }
  0xb7   : > { %407 = vst.msk [vmem:[#allocation2] sm:$0x1] %vm406_vm1, %v382_v20 }
  0xb8   : > { %410 = vst.msk [vmem:[#allocation2 + $0x1] sm:$0x1] %vm406_vm1, %v382_v20 }
  0xbb   : > { %v391_v21 = vpop.f32.mrf.mxu2 }
  0xbc   : > { %403 = vst.msk [vmem:[#allocation2 + $0x22] sm:$0xff] %vm321_vm0, %v391_v21 }
  0xbd   : > { %415 = vst.msk [vmem:[#allocation2 + $0x23] sm:$0x80] %vm413_vm2, %v391_v21  ;;  %v385_v22 = vpop.f32.mrf.mxu0  ;;  %v450_v27 = vld [vmem:[#allocation2 + $0x2] sm:$0xff] }
  0xbe   : > { %418 = vst.msk [vmem:[#allocation2 + $0x24] sm:$0x80] %vm413_vm2, %v391_v21  ;;  %v456_v31 = vmul.f32 0.4, %v450_v27 }
  0xbf   : > { %401 = vst.msk [vmem:[#allocation2 + $0xa] sm:$0xff] %vm321_vm0, %v385_v22  ;;  %v420_v23 = vld [vmem:[#allocation2] sm:$0xff] }
  0xc0   : > { %v432_v24 = vld [vmem:[#allocation2 + $0x1] sm:$0xff]  ;;  %414 = vst.msk [vmem:[#allocation2 + $0xb] sm:$0x80] %vm413_vm2, %v385_v22  ;;  %v426_v25 = vmul.f32 0.05, %v420_v23 }
  0xc1   : > { %v438_v26 = vmul.f32 0.25, %v432_v24  ;;  %417 = vst.msk [vmem:[#allocation2 + $0xc] sm:$0x80] %vm413_vm2, %v385_v22 }
  0xc3   : > { %v394_v28 = vpop.f32.mrf.mxu2  ;;  %v444_v29 = vadd.f32 %v438_v26, %v426_v25  ;;  %v453_v40 = vld [vmem:[#allocation2 + $0x22] sm:$0xff] }
  0xc4   : > { %404 = vst.msk [vmem:[#allocation2 + $0x32] sm:$0xff] %vm321_vm0, %v394_v28  ;;  %v459_v52 = vmul.f32 0.4, %v453_v40  ;;  %v471_v61 = vld [vmem:[#allocation2 + $0x23] sm:$0xff] }
  0xc5   : > { %409 = vst.msk [vmem:[#allocation2 + $0x30] sm:$0x1] %vm406_vm1, %v394_v28  ;;  %v388_v30 = vpop.f32.mrf.mxu0  ;;  %v462_v35 = vadd.f32 %v456_v31, %v444_v29  ;;  %v489_v2 = vld [vmem:[#allocation2 + $0x24] sm:$0xff]  ;;  %v477_v20 = vmul.f32 0.25, %v471_v61 }
  0xc6   : > { %412 = vst.msk [vmem:[#allocation2 + $0x31] sm:$0x1] %vm406_vm1, %v394_v28  ;;  %v468_v32 = vld [vmem:[#allocation2 + $0x3] sm:$0xff]  ;;  %v495_v23 = vmul.f32 0.05, %v489_v2 }
  0xc7   : > { %v486_v33 = vld [vmem:[#allocation2 + $0x4] sm:$0xff]  ;;  %402 = vst.msk [vmem:[#allocation2 + $0x1a] sm:$0xff] %vm321_vm0, %v388_v30  ;;  %v474_v36 = vmul.f32 0.25, %v468_v32 }
  0xc8   : > { %v421_v34 = vld [vmem:[#allocation2 + $0x8] sm:$0xff]  ;;  %408 = vst.msk [vmem:[#allocation2 + $0x18] sm:$0x1] %vm406_vm1, %v388_v30  ;;  %v492_v42 = vmul.f32 0.05, %v486_v33 }
  0xc9   : > { %v427_v37 = vmul.f32 0.05, %v421_v34  ;;  %v433_v38 = vld [vmem:[#allocation2 + $0x9] sm:$0xff]  ;;  %411 = vst.msk [vmem:[#allocation2 + $0x19] sm:$0x1] %vm406_vm1, %v388_v30  ;;  %v480_v41 = vadd.f32 %v474_v36, %v462_v35 }
  0xca   : > { %v451_v39 = vld [vmem:[#allocation2 + $0xa] sm:$0xff]  ;;  %v439_v43 = vmul.f32 0.25, %v433_v38 }
  0xcb   : > { %v469_v44 = vld [vmem:[#allocation2 + $0xb] sm:$0xff]  ;;  %v397_v47 = vpop.f32.mrf.mxu2  ;;  %v498_v48 = vadd.f32 %v492_v42, %v480_v41  ;;  %v457_v50 = vmul.f32 0.4, %v451_v39 }
  0xcc   : > { %v487_v46 = vld [vmem:[#allocation2 + $0xc] sm:$0xff]  ;;  %v445_v49 = vadd.f32 %v439_v43, %v427_v37  ;;  %405 = vst.msk [vmem:[#allocation2 + $0x3a] sm:$0xff] %vm321_vm0, %v397_v47  ;;  %v475_v51 = vmul.f32 0.25, %v469_v44 }
  0xcd   : > { %v454_v53 = vld [vmem:[#allocation2 + $0x32] sm:$0xff]  ;;  %416 = vst.msk [vmem:[#allocation2 + $0x3b] sm:$0x80] %vm413_vm2, %v397_v47  ;;  %v504_v54 = vmul.f32 %v498_v48, %v1436_v45  ;;  %v493_v56 = vmul.f32 0.05, %v487_v46 }
  0xce   : > { %v463_v55 = vadd.f32 %v457_v50, %v445_v49  ;;  %v424_v57 = vld [vmem:[#allocation2 + $0x30] sm:$0xff]  ;;  %419 = vst.msk [vmem:[#allocation2 + $0x3c] sm:$0x80] %vm413_vm2, %v397_v47  ;;  %v423_v59 = vld [vmem:[#allocation2 + $0x20] sm:$0xff]  ;;  %v460_v3 = vmul.f32 0.4, %v454_v53 }
  0xcf   : > { %v436_v58 = vld [vmem:[#allocation2 + $0x31] sm:$0xff]  ;;  %v435_v60 = vld [vmem:[#allocation2 + $0x21] sm:$0xff]  ;;  %927 = vmatmul.msk.f32.vlgmr.msra.gmra.mxu1 %vm321_vm0, %v504_v54  ;;  %v429_v0 = vmul.f32 0.05, %v423_v59  ;;  %v430_v9 = vmul.f32 0.05, %v424_v57 }
  0xd0   : > { %v442_v62 = vmul.f32 0.25, %v436_v58  ;;  %v481_v63 = vadd.f32 %v475_v51, %v463_v55  ;;  %v441_v1 = vmul.f32 0.25, %v435_v60  ;;  %v422_v4 = vld [vmem:[#allocation2 + $0x18] sm:$0xff] }
  0xd1   : > { %v434_v5 = vld [vmem:[#allocation2 + $0x19] sm:$0xff]  ;;  %v428_v15 = vmul.f32 0.05, %v422_v4 }
  0xd2   : > { %v452_v8 = vld [vmem:[#allocation2 + $0x1a] sm:$0xff]  ;;  %v499_v11 = vadd.f32 %v493_v56, %v481_v63  ;;  %v447_v14 = vadd.f32 %v441_v1, %v429_v0  ;;  %v440_v16 = vmul.f32 0.25, %v434_v5  ;;  %v448_v21 = vadd.f32 %v442_v62, %v430_v9 }
  0xd3   : > { %v470_v17 = vld [vmem:[#allocation2 + $0x1b] sm:$0xff]  ;;  %v458_v25 = vmul.f32 0.4, %v452_v8  ;;  %v472_v26 = vld [vmem:[#allocation2 + $0x33] sm:$0xff] }
  0xd4   : > { %v465_v22 = vadd.f32 %v459_v52, %v447_v14  ;;  %v446_v24 = vadd.f32 %v440_v16, %v428_v15  ;;  %v425_v27 = vld [vmem:[#allocation2 + $0x38] sm:$0xff]  ;;  %v505_v28 = vmul.f32 %v499_v11, %v327_v10  ;;  %v476_v29 = vmul.f32 0.25, %v470_v17 }
  0xd5   : > { %v488_v30 = vld [vmem:[#allocation2 + $0x1c] sm:$0xff]  ;;  %v466_v31 = vadd.f32 %v460_v3, %v448_v21  ;;  %v478_v32 = vmul.f32 0.25, %v472_v26  ;;  %v431_v36 = vmul.f32 0.05, %v425_v27  ;;  %v490_v43 = vld [vmem:[#allocation2 + $0x34] sm:$0xff] }
  0xd6   : > { %v437_v33 = vld [vmem:[#allocation2 + $0x39] sm:$0xff]  ;;  %v483_v34 = vadd.f32 %v477_v20, %v465_v22  ;;  %v464_v35 = vadd.f32 %v458_v25, %v446_v24  ;;  %v494_v41 = vmul.f32 0.05, %v488_v30  ;;  %v496_v50 = vmul.f32 0.05, %v490_v43 }
  0xd7   : > { %v443_v37 = vmul.f32 0.25, %v437_v33  ;;  %v455_v38 = vld [vmem:[#allocation2 + $0x3a] sm:$0xff]  ;;  %928 = vmatmul.msk.f32.gmra.mxu1 %vm321_vm0, %v505_v28  ;;  %v484_v42 = vadd.f32 %v478_v32, %v466_v31 }
  0xd8   : > { %v501_v39 = vadd.f32 %v495_v23, %v483_v34  ;;  %v482_v40 = vadd.f32 %v476_v29, %v464_v35  ;;  %v461_v48 = vmul.f32 0.4, %v455_v38  ;;  %v473_v49 = vld [vmem:[#allocation2 + $0x3b] sm:$0xff] }
  0xd9   : > { %v449_v47 = vadd.f32 %v443_v37, %v431_v36  ;;  %v502_v52 = vadd.f32 %v496_v50, %v484_v42  ;;  %v479_v54 = vmul.f32 0.25, %v473_v49  ;;  %v491_v55 = vld [vmem:[#allocation2 + $0x3c] sm:$0xff] }
  0xda   : > { %v507_v44 = vmul.f32 %v501_v39, %v327_v10  ;;  %v500_v46 = vadd.f32 %v494_v41, %v482_v40  ;;  %v497_v58 = vmul.f32 0.05, %v491_v55 }
  0xdb   : > { %v467_v53 = vadd.f32 %v461_v48, %v449_v47  ;;  %v508_v56 = vmul.f32 %v502_v52, %v1436_v45 }
  0xdc   : > { %930 = vmatmul.msk.f32.vlgmr.msra.gmra.mxu3 %vm321_vm0, %v507_v44  ;;  %v506_v51 = vmul.f32 %v500_v46, %v1436_v45 }
  0xdd   : > { %v485_v57 = vadd.f32 %v479_v54, %v467_v53 }
  0xdf   : > { %929 = vmatmul.msk.f32.gmra.mxu1 %vm321_vm0, %v506_v51  ;;  %v503_v59 = vadd.f32 %v497_v58, %v485_v57 }
  0xe1   : > { %v509_v60 = vmul.f32 %v503_v59, %v327_v10 }
  0xe4   : > { %931 = vmatmul.msk.f32.gmra.mxu3 %vm321_vm0, %v508_v56 }
  0xec   : > { %932 = vmatmul.msk.f32.gmra.mxu3 %vm321_vm0, %v509_v60 }
 0x14c   : > { %v545_v61 = vpop.f32.mrf.mxu1 }
 0x14d   : > { %563 = vst.msk [vmem:[#allocation2 + $0x2] sm:$0xff] %vm321_vm0, %v545_v61 }
 0x14e   : > { %569 = vst.msk [vmem:[#allocation2] sm:$0x1] %vm406_vm1, %v545_v61 }
 0x14f   : > { %572 = vst.msk [vmem:[#allocation2 + $0x1] sm:$0x1] %vm406_vm1, %v545_v61 }
 0x154   : > { %v548_v62 = vpop.f32.mrf.mxu1  ;;  %v611_v2 = vld [vmem:[#allocation2 + $0x2] sm:$0xff] }
 0x155   : > { %564 = vst.msk [vmem:[#allocation2 + $0xa] sm:$0xff] %vm321_vm0, %v548_v62  ;;  %v617_v4 = vmul.f32 0.4, %v611_v2 }
 0x156   : > { %v581_v63 = vld [vmem:[#allocation2] sm:$0xff]  ;;  %575 = vst.msk [vmem:[#allocation2 + $0xb] sm:$0x80] %vm413_vm2, %v548_v62 }
 0x157   : > { %v593_v45 = vld [vmem:[#allocation2 + $0x1] sm:$0xff]  ;;  %v587_v0 = vmul.f32 0.05, %v581_v63  ;;  %578 = vst.msk [vmem:[#allocation2 + $0xc] sm:$0x80] %vm413_vm2, %v548_v62  ;;  %v1234_v63 = vmov 0.0  }
 0x158   : > { %v599_v1 = vmul.f32 0.25, %v593_v45  ;;  %322 = vst.msk [vmem:[#allocation3] sm:$0xff] %vm321_vm0, %v1234_v63 }
 0x159   : > { %323 = vst.msk [vmem:[#allocation3 + $0x8] sm:$0xff] %vm321_vm0, %v1234_v63 }
 0x15a   : > { %v605_v3 = vadd.f32 %v599_v1, %v587_v0 }
 0x15c   : > { %v582_v5 = vld [vmem:[#allocation2 + $0x8] sm:$0xff]  ;;  %v551_v10 = vpop.f32.mrf.mxu1  ;;  %v623_v16 = vadd.f32 %v617_v4, %v605_v3 }
 0x15d   : > { %v594_v8 = vld [vmem:[#allocation2 + $0x9] sm:$0xff]  ;;  %v588_v11 = vmul.f32 0.05, %v582_v5  ;;  %565 = vst.msk [vmem:[#allocation2 + $0x1a] sm:$0xff] %vm321_vm0, %v551_v10 }
 0x15e   : > { %v612_v9 = vld [vmem:[#allocation2 + $0xa] sm:$0xff]  ;;  %v600_v14 = vmul.f32 0.25, %v594_v8  ;;  %570 = vst.msk [vmem:[#allocation2 + $0x18] sm:$0x1] %vm406_vm1, %v551_v10 }
 0x15f   : > { %v629_v15 = vld [vmem:[#allocation2 + $0x3] sm:$0xff]  ;;  %v630_v17 = vld [vmem:[#allocation2 + $0xb] sm:$0xff]  ;;  %v554_v22 = vpop.f32.mrf.mxu3  ;;  %v618_v24 = vmul.f32 0.4, %v612_v9  ;;  %573 = vst.msk [vmem:[#allocation2 + $0x19] sm:$0x1] %vm406_vm1, %v551_v10 }
 0x160   : > { %v635_v20 = vmul.f32 0.25, %v629_v15  ;;  %v647_v21 = vld [vmem:[#allocation2 + $0x4] sm:$0xff]  ;;  %v606_v23 = vadd.f32 %v600_v14, %v588_v11  ;;  %566 = vst.msk [vmem:[#allocation2 + $0x22] sm:$0xff] %vm321_vm0, %v554_v22  ;;  %v648_v26 = vld [vmem:[#allocation2 + $0xc] sm:$0xff]  ;;  %v636_v29 = vmul.f32 0.25, %v630_v17 }
 0x161   : > { %v653_v27 = vmul.f32 0.05, %v647_v21  ;;  %576 = vst.msk [vmem:[#allocation2 + $0x23] sm:$0x80] %vm413_vm2, %v554_v22  ;;  %v654_v32 = vmul.f32 0.05, %v648_v26 }
 0x162   : > { %v641_v25 = vadd.f32 %v635_v20, %v623_v16  ;;  %v624_v28 = vadd.f32 %v618_v24, %v606_v23  ;;  %579 = vst.msk [vmem:[#allocation2 + $0x24] sm:$0x80] %vm413_vm2, %v554_v22 }
 0x164   : > { %v659_v30 = vadd.f32 %v653_v27, %v641_v25  ;;  %v642_v31 = vadd.f32 %v636_v29, %v624_v28  ;;  %v613_v46 = vld [vmem:[#allocation2 + $0x1a] sm:$0xff] }
 0x165   : > { %v619_v54 = vmul.f32 0.4, %v613_v46 }
 0x166   : > { %v665_v33 = vsub.f32 %v1389_v6, %v659_v30  ;;  %v660_v34 = vadd.f32 %v654_v32, %v642_v31  ;;  %v583_v43 = vld [vmem:[#allocation2 + $0x18] sm:$0xff] }
 0x167   : > { %v584_v35 = vld [vmem:[#allocation2 + $0x20] sm:$0xff]  ;;  %v557_v38 = vpop.f32.mrf.mxu3  ;;  %v589_v48 = vmul.f32 0.05, %v583_v43 }
 0x168   : > { %v596_v36 = vld [vmem:[#allocation2 + $0x21] sm:$0xff]  ;;  %v590_v39 = vmul.f32 0.05, %v584_v35  ;;  %v666_v41 = vsub.f32 %v1401_v12, %v660_v34  ;;  %v673_v42 = vmul.f32 %v665_v33, %v665_v33  ;;  %v595_v44 = vld [vmem:[#allocation2 + $0x19] sm:$0xff]  ;;  %567 = vst.msk [vmem:[#allocation2 + $0x32] sm:$0xff] %vm321_vm0, %v557_v38 }
 0x169   : > { %v614_v37 = vld [vmem:[#allocation2 + $0x22] sm:$0xff]  ;;  %v602_v40 = vmul.f32 0.25, %v596_v36  ;;  %v601_v49 = vmul.f32 0.25, %v595_v44  ;;  %571 = vst.msk [vmem:[#allocation2 + $0x30] sm:$0x1] %vm406_vm1, %v557_v38 }
 0x16a   : > { %v620_v47 = vmul.f32 0.4, %v614_v37  ;;  %v632_v51 = vld [vmem:[#allocation2 + $0x23] sm:$0xff]  ;;  %v631_v6 = vld [vmem:[#allocation2 + $0x1b] sm:$0xff]  ;;  %574 = vst.msk [vmem:[#allocation2 + $0x31] sm:$0x1] %vm406_vm1, %v557_v38  ;;  %v674_v12 = vmul.f32 %v666_v41, %v666_v41 }
 0x16b   : > { %v608_v50 = vadd.f32 %v602_v40, %v590_v39  ;;  %v650_v52 = vld [vmem:[#allocation2 + $0x24] sm:$0xff]  ;;  %v607_v53 = vadd.f32 %v601_v49, %v589_v48  ;;  %v638_v56 = vmul.f32 0.25, %v632_v51  ;;  %v1467_v57 = vadd.f32 1e-06, %v673_v42  ;;  %v649_v58 = vld [vmem:[#allocation2 + $0x1c] sm:$0xff] }
 0x16c   : > { %v637_v60 = vmul.f32 0.25, %v631_v6  ;;  %v656_v62 = vmul.f32 0.05, %v650_v52  ;;  %v655_v1 = vmul.f32 0.05, %v649_v58 }
 0x16d   : > { %v626_v55 = vadd.f32 %v620_v47, %v608_v50  ;;  %v625_v59 = vadd.f32 %v619_v54, %v607_v53  ;;  %v1472_v3 = vadd.f32 1e-06, %v674_v12  ;;  %1034 = vrsqrt.f32 %v1467_v57 }
 0x16e   : > { %vm692_vm4 = vcmp.eq.f32.partialorder %v1467_v57, inf  ;;  %vm694_vm6 = vcmp.eq.f32.partialorder %v1467_v57, 0.0 }
 0x16f   : > { %v644_v61 = vadd.f32 %v638_v56, %v626_v55  ;;  %v560_v45 = vpop.f32.mrf.mxu3  ;;  %v643_v0 = vadd.f32 %v637_v60, %v625_v59  ;;  %v615_v16 = vld [vmem:[#allocation2 + $0x32] sm:$0xff]  ;;  %1036 = vrsqrt.f32 %v1472_v3  ;;  %vm704_vm8 = vcmp.eq.f32.partialorder %v1472_v3, inf }
 0x170   : > { %568 = vst.msk [vmem:[#allocation2 + $0x3a] sm:$0xff] %vm321_vm0, %v560_v45  ;;  %v621_v23 = vmul.f32 0.4, %v615_v16  ;;  %vm706_vm9 = vcmp.eq.f32.partialorder %v1472_v3, 0.0 }
 0x171   : > { %v662_v2 = vadd.f32 %v656_v62, %v644_v61  ;;  %577 = vst.msk [vmem:[#allocation2 + $0x3b] sm:$0x80] %vm413_vm2, %v560_v45  ;;  %v661_v4 = vadd.f32 %v655_v1, %v643_v0  ;;  %v585_v8 = vld [vmem:[#allocation2 + $0x30] sm:$0xff] }
 0x172   : > { %580 = vst.msk [vmem:[#allocation2 + $0x3c] sm:$0x80] %vm413_vm2, %v560_v45  ;;  %v597_v9 = vld [vmem:[#allocation2 + $0x31] sm:$0xff]  ;;  %v591_v14 = vmul.f32 0.05, %v585_v8 }
 0x173   : > { %v668_v5 = vsub.f32 %v1391_v7, %v662_v2  ;;  %v667_v10 = vsub.f32 %v1413_v18, %v661_v4  ;;  %v603_v15 = vmul.f32 0.25, %v597_v9  ;;  %v1035_v22 = vpop.eup %1034 }
 0x174   : > { %v686_v33 = vmul.f32 %v1035_v22, %v1467_v57 }
 0x175   : > { %v676_v11 = vmul.f32 %v668_v5, %v668_v5  ;;  %v675_v17 = vmul.f32 %v667_v10, %v667_v10  ;;  %v609_v21 = vadd.f32 %v603_v15, %v591_v14  ;;  %v1037_v34 = vpop.eup %1036 }
 0x176   : > { %v687_v44 = vmul.f32 %v1035_v22, %v686_v33  ;;  %v698_v46 = vmul.f32 %v1037_v34, %v1472_v3 }
 0x177   : > { %v1480_v20 = vadd.f32 1e-06, %v676_v11  ;;  %v586_v24 = vld [vmem:[#allocation2 + $0x38] sm:$0xff]  ;;  %v1482_v25 = vadd.f32 1e-06, %v675_v17  ;;  %v627_v28 = vadd.f32 %v621_v23, %v609_v21 }
 0x178   : > { %v598_v7 = vld [vmem:[#allocation2 + $0x39] sm:$0xff]  ;;  %v592_v26 = vmul.f32 0.05, %v586_v24  ;;  %v688_v54 = vmul.f32 0.5, %v687_v44  ;;  %v699_v55 = vmul.f32 %v1037_v34, %v698_v46 }
 0x179   : > { %1038 = vrsqrt.f32 %v1480_v20  ;;  %v616_v18 = vld [vmem:[#allocation2 + $0x3a] sm:$0xff]  ;;  %v604_v29 = vmul.f32 0.25, %v598_v7  ;;  %vm716_vm3 = vcmp.eq.f32.partialorder %v1482_v25, inf  ;;  %vm718_vm5 = vcmp.eq.f32.partialorder %v1482_v25, 0.0 }
 0x17a   : > { %v633_v27 = vld [vmem:[#allocation2 + $0x33] sm:$0xff]  ;;  %v634_v32 = vld [vmem:[#allocation2 + $0x3b] sm:$0xff]  ;;  %1040 = vrsqrt.f32 %v1482_v25  ;;  %v622_v36 = vmul.f32 0.4, %v616_v18  ;;  %v689_v63 = vsub.f32 1.5, %v688_v54  ;;  %v719_v24 = vand.u32 2147483648, %v1482_v25 }
 0x17b   : > { %v639_v30 = vmul.f32 0.25, %v633_v27  ;;  %v651_v31 = vld [vmem:[#allocation2 + $0x34] sm:$0xff]  ;;  %v610_v35 = vadd.f32 %v604_v29, %v592_v26  ;;  %v652_v39 = vld [vmem:[#allocation2 + $0x3c] sm:$0xff]  ;;  %v640_v41 = vmul.f32 0.25, %v634_v32  ;;  %vm728_vm7 = vcmp.eq.f32.partialorder %v1480_v20, inf }
 0x17c   : > { %v657_v38 = vmul.f32 0.05, %v651_v31  ;;  %v658_v48 = vmul.f32 0.05, %v652_v39  ;;  %v690_v4 = vmul.f32 %v1035_v22, %v689_v63  ;;  %vm730_vm10 = vcmp.eq.f32.partialorder %v1480_v20, 0.0 }
 0x17d   : > { %v645_v37 = vadd.f32 %v639_v30, %v627_v28  ;;  %v628_v40 = vadd.f32 %v622_v36, %v610_v35  ;;  %v695_v28 = vand.u32 2147483648, %v1467_v57  ;;  %v731_v33 = vand.u32 2147483648, %v1480_v20 }
 0x17e   : > { %v691_v11 = vmul.f32 %v690_v4, %v1467_v57 }
 0x17f   : > { %v663_v42 = vadd.f32 %v657_v38, %v645_v37  ;;  %v1039_v43 = vpop.eup %1038  ;;  %v646_v47 = vadd.f32 %v640_v41, %v628_v40  ;;  %v707_v37 = vand.u32 2147483648, %v1472_v3 }
 0x180   : > { %v722_v50 = vmul.f32 %v1039_v43, %v1480_v20  ;;  %v1041_v51 = vpop.eup %1040  ;;  %v693_v7 = vsel %vm692_vm4, %v1467_v57, %v691_v11 }
 0x181   : > { %v669_v49 = vsub.f32 %v1403_v13, %v663_v42  ;;  %v664_v6 = vadd.f32 %v658_v48, %v646_v47  ;;  %v710_v53 = vmul.f32 %v1041_v51, %v1482_v25  ;;  %v700_v13 = vmul.f32 0.5, %v699_v55  ;;  %v672_v55 = vld [vmem:[#allocation3 + $0x8] sm:$0xff] }
 0x182   : > { %v723_v56 = vmul.f32 %v1039_v43, %v722_v50 }
 0x183   : > { %v677_v52 = vmul.f32 %v669_v49, %v669_v49  ;;  %v670_v12 = vsub.f32 %v1415_v19, %v664_v6  ;;  %v711_v59 = vmul.f32 %v1041_v51, %v710_v53  ;;  %v701_v5 = vsub.f32 1.5, %v700_v13 }
 0x184   : > { %v724_v60 = vmul.f32 0.5, %v723_v56 }
 0x185   : > { %v683_v58 = vadd.f32 1e-06, %v677_v52  ;;  %v678_v61 = vmul.f32 %v670_v12, %v670_v12  ;;  %v712_v62 = vmul.f32 0.5, %v711_v59  ;;  %v702_v14 = vmul.f32 %v1037_v34, %v701_v5 }
 0x186   : > { %v725_v1 = vsub.f32 1.5, %v724_v60 }
 0x187   : > { %1042 = vrsqrt.f32 %v683_v58  ;;  %v1492_v45 = vadd.f32 1e-06, %v678_v61  ;;  %v713_v0 = vsub.f32 1.5, %v712_v62  ;;  %v703_v26 = vmul.f32 %v702_v14, %v1472_v3 }
 0x188   : > { %v726_v9 = vmul.f32 %v1039_v43, %v725_v1  ;;  %vm740_vm11 = vcmp.eq.f32.partialorder %v683_v58, inf  ;;  %v743_v39 = vand.u32 2147483648, %v683_v58  ;;  %vm742_vm12 = vcmp.eq.f32.partialorder %v683_v58, 0.0 }
 0x189   : > { %1044 = vrsqrt.f32 %v1492_v45  ;;  %v714_v2 = vmul.f32 %v1041_v51, %v713_v0  ;;  %v705_v34 = vsel %vm704_vm8, %v1472_v3, %v703_v26  ;;  %vm752_vm13 = vcmp.eq.f32.partialorder %v1492_v45, inf }
 0x18a   : > { %v727_v21 = vmul.f32 %v726_v9, %v1480_v20  ;;  %v708_v43 = vsel %vm706_vm9, %v707_v37, %v705_v34  ;;  %v755_v3 = vand.u32 2147483648, %v1492_v45  ;;  %vm754_vm14 = vcmp.eq.f32.partialorder %v1492_v45, 0.0 }
 0x18b   : > { %v715_v19 = vmul.f32 %v714_v2, %v1482_v25  ;;  %v762_v6 = vsel %vm321_vm0, %v708_v43, 0.0 }
 0x18c   : > { %v729_v30 = vsel %vm728_vm7, %v1480_v20, %v727_v21  ;;  %v671_v20 = vld [vmem:[#allocation3] sm:$0xff] }
 0x18d   : > { %v1043_v8 = vpop.eup %1042  ;;  %v717_v17 = vsel %vm716_vm3, %v1482_v25, %v715_v19  ;;  %v696_v25 = vsel %vm694_vm6, %v695_v28, %v693_v7  ;;  %v732_v38 = vsel %vm730_vm10, %v731_v33, %v729_v30 }
 0x18e   : > { %v734_v10 = vmul.f32 %v1043_v8, %v683_v58  ;;  %v720_v29 = vsel %vm718_vm5, %v719_v24, %v717_v17  ;;  %v757_v42 = vsel %vm321_vm0, %v696_v25, 0.0  ;;  %v763_v49 = vsel %vm321_vm0, %v732_v38, 0.0 }
 0x18f   : > { %v1045_v16 = vpop.eup %1044  ;;  %v758_v36 = vsel %vm321_vm0, %v720_v29, 0.0  ;;  %v764_v53 = vadd.f32 %v763_v49, %v762_v6 }
 0x190   : > { %v735_v15 = vmul.f32 %v1043_v8, %v734_v10  ;;  %v746_v22 = vmul.f32 %v1045_v16, %v1492_v45  ;;  %v759_v46 = vadd.f32 %v758_v36, %v757_v42 }
 0x192   : > { %v736_v23 = vmul.f32 0.5, %v735_v15  ;;  %v747_v27 = vmul.f32 %v1045_v16, %v746_v22 }
 0x194   : > { %v737_v18 = vsub.f32 1.5, %v736_v23  ;;  %v748_v32 = vmul.f32 0.5, %v747_v27 }
 0x196   : > { %v738_v31 = vmul.f32 %v1043_v8, %v737_v18  ;;  %v749_v57 = vsub.f32 1.5, %v748_v32 }
 0x198   : > { %v739_v35 = vmul.f32 %v738_v31, %v683_v58  ;;  %v750_v41 = vmul.f32 %v1045_v16, %v749_v57 }
 0x19a   : > { %v741_v40 = vsel %vm740_vm11, %v683_v58, %v739_v35  ;;  %v751_v47 = vmul.f32 %v750_v41, %v1492_v45 }
 0x19b   : > { %v744_v44 = vsel %vm742_vm12, %v743_v39, %v741_v40 }
 0x19c   : > { %v760_v48 = vsel %vm321_vm0, %v744_v44, 0.0  ;;  %v753_v51 = vsel %vm752_vm13, %v1492_v45, %v751_v47 }
 0x19d   : > { %v761_v50 = vadd.f32 %v760_v48, %v759_v46  ;;  %v756_v52 = vsel %vm754_vm14, %v755_v3, %v753_v51 }
 0x19e   : > { %v765_v56 = vsel %vm321_vm0, %v756_v52, 0.0 }
 0x19f   : > { %v767_v54 = vadd.f32 %v761_v50, %v671_v20  ;;  %v766_v12 = vadd.f32 %v765_v56, %v764_v53 }
 0x1a1   : > { %769 = vst.msk [vmem:[#allocation3] sm:$0xff] %vm321_vm0, %v767_v54  ;;  %v768_v58 = vadd.f32 %v766_v12, %v672_v55 }
 0x1a3   : > { %770 = vst.msk [vmem:[#allocation3 + $0x8] sm:$0xff] %vm321_vm0, %v768_v58 }
 0x1a8   : > { %v774_v59 = vld [vmem:[#allocation3] sm:$0xff] }
 0x1a9   : > { %v776_v61 = vsel %vm321_vm0, %v774_v59, 0.0 }
 0x1aa   : > { %v775_v60 = vld [vmem:[#allocation3 + $0x8] sm:$0xff] }
 0x1ab   : > { %v777_v62 = vsel %vm321_vm0, %v775_v60, 0.0 }
 0x1ac   : > { %v778_v63 = vadd.f32 %v777_v62, %v776_v61 }
 0x1ae   : > { %779 = vadd.xlane.f32.xlu0 %v778_v63 }
 0x221   : > { %v780_v13 = vpop.xlane.xlu0 %779 }
 0x222   : > { %v781_v45 = vrot.slane %v780_v13, 4 }
 0x224   : > { %v782_v0 = vadd.f32 %v781_v45, %v780_v13 }
 0x226   : > { %v783_v1 = vrot.slane %v782_v0, 2 }
 0x228   : > { %v784_v2 = vadd.f32 %v783_v1, %v782_v0 }
 0x22a   : > { %v785_v4 = vrot.slane %v784_v2, 1 }
 0x22c   : > { %v786_v5 = vadd.f32 %v785_v4, %v784_v2 }
 0x22e   : > { %948 = vpush %v786_v5 }
 0x25f   : > { %s949_s25 = spop %948 }
 0x260   : > { %v788_v8 = vstv %s949_s25 }
 0x261   : > { %789 = vst [vmem:[%s316_s15] sm:$0xff] %v788_v8 }
 0x262 PF: > { %s21_s20 = sadd.s32 1, %s1228_s20   ;;  %s1569_s15 = smov %s1212_s16 }
 0x263   : > { %p18_p2 = scmp.ge.s32.totalorder %s21_s20, 4   ;;  %s1570_s16 = smov %s1216_s17 }
 0x264   : > { %s1571_s17 = smov %s1341_s26  ;;  %s1572_s18 = smov %s1224_s19 }
 0x265   : > { %s1573_s19 = smov %s1575_s11  ;;  %20 = sbr.rel (!%p18_p2) target bundleno = 10 (0xa), region = 105 }
 0x26a   :  { %809 = vsyncpa [#allocation5], 1 }
 0x26b   :  { %811 = vsyncpa [#allocation5 + $0x1], 1 }
 0x26c   :  { %812 = vsyncpa [#allocation7], 1 }
 0x26d   :  { %814 = vsyncpa [#allocation7 + $0x1], 1 }
 0x26e   :  { %815 = vsyncpa [#allocation10], 1 }

</bundles_post_ra>
